<compile_context>
chip_gen: v7x
topology: tpu7x:2x2x1
jax: 0.10.0
libtpu: 0.0.40
codegen_flags: <defaults>
</compile_context>

<pallas_src>
import jax
import jax.numpy as jnp
from jax.experimental import pallas as pl
from jax.experimental.pallas import tpu as pltpu


def _linear_kernel(x_ref, p_ref, o_ref):
    # x_ref: [B, 2]  (VMEM) activations
    # p_ref: [3, 2]  (VMEM) packed params: row 0 = W[:, 0] (= W.T row 0),
    #                                      row 1 = W[:, 1] (= W.T row 1),
    #                                      row 2 = bias
    # o_ref: [B, 2]  (VMEM) output
    x = x_ref[...]                 # [B, 2]

    w0 = p_ref[0:1, :]             # [1, 2] weights applied to input feature 0
    w1 = p_ref[1:2, :]             # [1, 2] weights applied to input feature 1
    b = p_ref[2:3, :]              # [1, 2] bias row

    # out[:, o] = x[:, 0] * W[o, 0] + x[:, 1] * W[o, 1] + b[o]
    # Rank-1 broadcast FMAs on the VPU; no MXU, no concatenate, one store.
    out = x[:, 0:1] * w0 + x[:, 1:2] * w1 + b
    o_ref[...] = out.astype(o_ref.dtype)   # single full-tile store


def pack_params(weight, bias):
    """Pack nn.Linear params once (parameter-load time, not per forward).

    weight: [Fout, Fin] (PyTorch layout), bias: [Fout]
    returns [Fin + 1, Fout]: rows = W.T rows, last row = bias.
    """
    return jnp.concatenate([weight.T, bias[None, :]], axis=0)


def minimum_network_forward(x, packed_params):
    """x: [B, 2] float32; packed_params: [3, 2] from pack_params()."""
    B, _ = x.shape
    fout = packed_params.shape[1]

    # Tiny problem: no grid, whole arrays as single blocks; everything lands
    # in VMEM with exactly three DMAs (x in, packed params in, out back).
    return pl.pallas_call(
        _linear_kernel,
        out_shape=jax.ShapeDtypeStruct((B, fout), x.dtype),
        in_specs=[
            pl.BlockSpec(memory_space=pltpu.MemorySpace.VMEM),   # x
            pl.BlockSpec(memory_space=pltpu.MemorySpace.VMEM),   # packed params
        ],
        out_specs=pl.BlockSpec(memory_space=pltpu.MemorySpace.VMEM),
    )(x, packed_params)


if __name__ == "__main__":
    key = jax.random.PRNGKey(0)
    kx, kw, kb = jax.random.split(key, 3)

    B, Fin, Fout = 8, 2, 2  # nn.Linear(in_features=2, out_features=2)

    # Deterministic "parameters" (mimicking PyTorch's uniform(-1/sqrt(Fin), 1/sqrt(Fin)))
    bound = 1.0 / (Fin ** 0.5)
    weight = jax.random.uniform(kw, (Fout, Fin), jnp.float32, -bound, bound)
    bias = jax.random.uniform(kb, (Fout,), jnp.float32, -bound, bound)

    x = jax.random.normal(kx, (B, Fin), jnp.float32)

    params = pack_params(weight, bias)          # done once, outside the hot path
    out = minimum_network_forward(x, params)
    out = jax.block_until_ready(out)

    # Reference check against plain JAX (same math as torch.nn.Linear).
    ref = x @ weight.T + bias
    assert out.shape == (B, Fout)
    assert jnp.allclose(out, ref, atol=1e-5, rtol=1e-5)

    print("KERNEL_OK")
</pallas_src>

<mosaic_0001>
module attributes {stable_mosaic.version = 11 : i64} {
  func.func @_linear_kernel(%arg0: memref<8x2xf32, #tpu.memory_space<vmem>>, %arg1: memref<3x2xf32, #tpu.memory_space<vmem>>, %arg2: memref<8x2xf32, #tpu.memory_space<vmem>>) attributes {dimension_semantics = [], scalar_prefetch = 0 : i64, scratch_operands = 0 : i64, tpu.core_type = #tpu.core_type<tc>} {
    %c0 = arith.constant 0 : index
    %c0_0 = arith.constant 0 : index
    %0 = vector.load %arg0[%c0, %c0_0] : memref<8x2xf32, #tpu.memory_space<vmem>>, vector<8x2xf32>
    %c0_1 = arith.constant 0 : index
    %c0_2 = arith.constant 0 : index
    %1 = vector.load %arg1[%c0_1, %c0_2] : memref<3x2xf32, #tpu.memory_space<vmem>>, vector<1x2xf32>
    %c1 = arith.constant 1 : index
    %c0_3 = arith.constant 0 : index
    %2 = vector.load %arg1[%c1, %c0_3] : memref<3x2xf32, #tpu.memory_space<vmem>>, vector<1x2xf32>
    %c2 = arith.constant 2 : index
    %c0_4 = arith.constant 0 : index
    %3 = vector.load %arg1[%c2, %c0_4] : memref<3x2xf32, #tpu.memory_space<vmem>>, vector<1x2xf32>
    %4 = vector.extract_strided_slice %0 {offsets = [0, 0], sizes = [8, 1], strides = [1, 1]} : vector<8x2xf32> to vector<8x1xf32>
    %5 = vector.broadcast %4 : vector<8x1xf32> to vector<8x2xf32>
    %6 = vector.broadcast %1 : vector<1x2xf32> to vector<8x2xf32>
    %7 = arith.mulf %5, %6 : vector<8x2xf32>
    %8 = vector.extract_strided_slice %0 {offsets = [0, 1], sizes = [8, 1], strides = [1, 1]} : vector<8x2xf32> to vector<8x1xf32>
    %9 = vector.broadcast %8 : vector<8x1xf32> to vector<8x2xf32>
    %10 = vector.broadcast %2 : vector<1x2xf32> to vector<8x2xf32>
    %11 = arith.mulf %9, %10 : vector<8x2xf32>
    %12 = arith.addf %7, %11 : vector<8x2xf32>
    %13 = vector.broadcast %3 : vector<1x2xf32> to vector<8x2xf32>
    %14 = arith.addf %12, %13 : vector<8x2xf32>
    %c0_5 = arith.constant 0 : index
    %c0_6 = arith.constant 0 : index
    %15 = vector.load %arg2[%c0_5, %c0_6] : memref<8x2xf32, #tpu.memory_space<vmem>>, vector<8x2xf32>
    tpu.vector_store %arg2[%c0_5, %c0_6], %14 {strides = array<i32>} : memref<8x2xf32, #tpu.memory_space<vmem>>, vector<8x2xf32>,
    return
  }
}

</mosaic_0001>

<bundles_post_ra>
// kernel: tpu_custom_call.1
= control target key start
LH: loop header
LB: loop body
LE: loop exit
PB: predicated region body
PF: predicated region fallthrough
CT: control target
= control target key end

     0   :  { %v53_v0 = vmov 0   ;;  %v54_v2 = vmov 1   ;;  %vm40_vm0 = vcmask 15360   ;;  %s85_s0 = inlined_call_operand.vmem [shape: f32[8,2], index: 0, kind: input, shape index: {}]   ;;  %s86_s1 = inlined_call_operand.vmem [shape: f32[3,2], index: 1, kind: input, shape index: {}]   ;;  %s87_s2 = inlined_call_operand.vmem [shape: f32[8,2], index: 2, kind: output, shape index: {}]  }
   0x1   :  { %51 = vset.pattern.permute.xlu0 %v53_v0  ;;  %v11_v1 = vld [vmem:[%s85_s0] sm:$0xff] }
   0x2   :  { %17 = vperm.xlu0 %51, %v11_v1   ;;  %v46_v4 = vld [vmem:[%s86_s1] ss:$0 sm:$0xff]  ;;  %v47_v5 = vld [vmem:[%s86_s1 + $0x1] ss:$0 sm:$0xff]  ;;  %v48_v9 = vld [vmem:[%s86_s1 + $0x2] ss:$0 sm:$0xff] }
   0x6   :  { %52 = vset.pattern.permute.xlu0 %v54_v2 }
   0x7   :  { %26 = vperm.xlu0 %52, %v11_v1  }
  0x81   :  { %v18_v3 = vpop.permute.xlu0 %17 }
  0x82   :  { %v24_v7 = vmul.f32 %v46_v4, %v18_v3 }
  0x86   :  { %v27_v6 = vpop.permute.xlu0 %26 }
  0x87   :  { %v33_v8 = vmul.f32 %v47_v5, %v27_v6 }
  0x89   :  { %v34_v10 = vadd.f32 %v33_v8, %v24_v7 }
  0x8b   :  { %v39_v11 = vadd.f32 %v48_v9, %v34_v10 }
  0x8d   :  { %41 = vst.msk [vmem:[%s87_s2] sm:$0xff] %vm40_vm0, %v39_v11 }

</bundles_post_ra>
